<compile_context>
chip_gen: v6e
topology: v6e:2x2x1
jax: 0.10.0
libtpu: 0.0.40
codegen_flags: <defaults>
</compile_context>

<pallas_src>
import functools

import jax
import jax.numpy as jnp
from jax import lax
from jax.experimental import pallas as pl
from jax.experimental.pallas import tpu as pltpu


# ---------------------------------------------------------------------------
# small helpers
# ---------------------------------------------------------------------------
def _round_up(v, m):
    return (v + m - 1) // m * m


def _pick_tile(padded, candidates):
    for t in candidates:
        if padded % t == 0:
            return t
    return padded


def _device_kind():
    try:
        return jax.devices()[0].device_kind.lower()
    except Exception:
        return ""


def _is_v7():
    kind = _device_kind()
    return ("v7" in kind) or ("tpu7" in kind)


# ---------------------------------------------------------------------------
# Kernel 1: activation quantization prologue
# ---------------------------------------------------------------------------
def _act_quant_kernel(x_ref, xq_ref, qs_ref, *, per_token):
    x = x_ref[...].astype(jnp.float32)
    if per_token:
        absmax = jnp.max(jnp.abs(x), axis=-1, keepdims=True)
        absmax = jnp.maximum(absmax, jnp.float32(1e-8))   # guard all-zero rows
        q = jnp.clip(jnp.round(x * (127.0 / absmax)), -128.0, 127.0)
        xq_ref[...] = q.astype(jnp.int8)
        qs_ref[...] = absmax * (1.0 / 127.0)
    else:
        xq_ref[...] = jnp.clip(jnp.round(x), -128.0, 127.0).astype(jnp.int8)
        qs_ref[...] = jnp.ones(qs_ref.shape, jnp.float32)


def _choose_quant_rows(M, K):
    """Rows per quant block (full-K rows; per-token needs the whole row)."""
    budget_rows = max(8, (8 << 20) // max(1, 4 * K))   # ~8 MiB f32 working set
    if M % 8 == 0:
        t = min(M, 512, budget_rows)
        t = max(8, t - (t % 8))
        while M % t != 0:
            t -= 8
        return t
    if M * K <= (4 << 20):        # small ragged M: single full-M block
        return M
    return None                   # fall back to plain JAX quantization


def _act_quant(x2, act_quant):
    """(M, K) activations -> (int8 (M, K), f32 (M, 1) per-row quant scale)."""
    M, K = x2.shape
    per_token = act_quant == "per-token"
    rows = _choose_quant_rows(M, K)
    if rows is None:
        # TODO(synk): ragged large-M fallback stays in plain JAX (XLA fuses it).
        xf = x2.astype(jnp.float32)
        if per_token:
            absmax = jnp.maximum(jnp.max(jnp.abs(xf), axis=-1, keepdims=True),
                                 jnp.float32(1e-8))
            xq = jnp.clip(jnp.round(xf * (127.0 / absmax)), -128.0, 127.0)
            return xq.astype(jnp.int8), absmax * (1.0 / 127.0)
        xq = jnp.clip(jnp.round(xf), -128.0, 127.0).astype(jnp.int8)
        return xq, jnp.ones((M, 1), jnp.float32)

    kernel = functools.partial(_act_quant_kernel, per_token=per_token)
    return pl.pallas_call(
        kernel,
        out_shape=(jax.ShapeDtypeStruct((M, K), jnp.int8),
                   jax.ShapeDtypeStruct((M, 1), jnp.float32)),
        grid=(M // rows,),
        in_specs=[pl.BlockSpec((rows, K), lambda i: (i, 0))],
        out_specs=(pl.BlockSpec((rows, K), lambda i: (i, 0)),
                   pl.BlockSpec((rows, 1), lambda i: (i, 0))),
        compiler_params=pltpu.CompilerParams(
            dimension_semantics=("parallel",)),
    )(x2)


# ---------------------------------------------------------------------------
# Kernel 2: tiled quantized GEMM with dequant + bias epilogue
# ---------------------------------------------------------------------------
def _w8a8_matmul_kernel(xq_ref, w_ref, dq_ref, bias_ref, o_ref, acc_ref, *,
                        use_int8_mxu):
    k = pl.program_id(2)

    @pl.when(k == 0)
    def _init():
        acc_ref[...] = jnp.zeros_like(acc_ref)

    if use_int8_mxu:
        # Native int8 x int8 -> int32 MXU path (v5e / v6e): exact.
        acc_ref[...] += lax.dot_general(
            xq_ref[...], w_ref[...],
            dimension_numbers=(((1,), (0,)), ((), ())),
            preferred_element_type=jnp.int32)
    else:
        # v7x MXU has no integer operands.  The weight tile was pre-cast to
        # bf16 at load time; only the (tm, tk) activation tile is cast here.
        # int8 values are exact in bf16 and per-tile sums stay < 2^24 for
        # tk <= 1024, so the in-MXU f32 accumulation is exact.
        # TODO(synk): cross-tile f32 accumulation is not bit-exact vs int32
        # for very large K (K >~ 2k); acceptable for quantized inference.
        a = xq_ref[...].astype(jnp.bfloat16)
        b = w_ref[...]
        if b.dtype != jnp.bfloat16:
            b = b.astype(jnp.bfloat16)
        acc_ref[...] += lax.dot_general(
            a, b, dimension_numbers=(((1,), (0,)), ((), ())),
            preferred_element_type=jnp.float32)

    @pl.when(k == pl.num_programs(2) - 1)
    def _store():
        acc = acc_ref[...].astype(jnp.float32)
        # dq_ref: (tm, 1) per-row dequant scale; bias_ref: (1, tn), added once.
        o_ref[...] = (dq_ref[...] * acc + bias_ref[...]).astype(o_ref.dtype)


# ---------------------------------------------------------------------------
# Tile selection
# ---------------------------------------------------------------------------
_TN_CANDIDATES = (1024, 512, 256, 128)
_TK_CANDIDATES_INT8 = (2048, 1024, 512, 256, 128)
_TK_CANDIDATES_BF16 = (1024, 512, 256, 128)   # keep per-tile sums < 2^24


def _choose_np_tn(N):
    """N padding + tile.  Prefer 256-multiples (fills the 256x256 MXU on
    v6e/v7x) when that costs <= ~12.5% extra column padding."""
    Np = _round_up(N, 128)
    tn = _pick_tile(Np, _TN_CANDIDATES)
    if tn == 128 and N > 128:
        Np2 = _round_up(N, 256)
        if (Np2 - Np) * 8 <= Np:
            return Np2, _pick_tile(Np2, _TN_CANDIDATES)
    return Np, tn


def _choose_tm(M):
    """Row tile: multiple of 32 when M >= 32 (clean int8 sublane packing),
    up to 512 for large M, while keeping row padding modest."""
    M = max(M, 1)
    if M <= 32:
        return _round_up(M, 8)
    if M <= 512:
        return _round_up(M, 32)
    for t in (512, 256, 128):
        if (_round_up(M, t) - M) * 8 <= M:
            return t
    return 128


def _vmem_usage(tm, tn, tk, x_bytes, w_bytes, out_bytes):
    # double-buffered input tiles + double-buffered output tile + accumulator
    return (2 * (tm * tk * x_bytes + tk * tn * w_bytes)
            + 2 * tm * tn * out_bytes + tm * tn * 4)


def _fit_vmem(tm, tn, tk, x_bytes, w_bytes, out_bytes, budget, Mp):
    while _vmem_usage(tm, tn, tk, x_bytes, w_bytes, out_bytes) > budget and tk > 128:
        tk //= 2
    while _vmem_usage(tm, tn, tk, x_bytes, w_bytes, out_bytes) > budget and tn > 128:
        tn //= 2
    while (_vmem_usage(tm, tn, tk, x_bytes, w_bytes, out_bytes) > budget
           and tm > 8 and (tm // 2) % 8 == 0 and Mp % (tm // 2) == 0):
        tm //= 2
    return tm, tn, tk


def _split_for_two_cores(Mp, tm, Np, tn, enabled):
    """v7x has 2 TensorCores sharded over the parallel grid axes; make sure
    there are at least 2 (i, j) programs when the shape allows it."""
    if not enabled or (Mp // tm) * (Np // tn) >= 2:
        return tm, tn
    if tn > 128:
        return tm, tn // 2
    if tm > 8 and (tm // 2) % 8 == 0 and Mp % (tm // 2) == 0:
        return tm // 2, tn
    return tm, tn


# ---------------------------------------------------------------------------
# Module wrapper (weight relayout done once, like loading the torch buffer)
# ---------------------------------------------------------------------------
class W8A8BFP32OFP32Linear:
    """JAX/Pallas TPU equivalent of autosmoothquant's W8A8BFP32OFP32Linear."""

    def __init__(self, weight_i8, bias_f32=None, dequant_scale=1.0,
                 act_quant="per-tensor", use_int8_mxu=None):
        assert act_quant in ("per-token", "per-tensor")
        self.act_quant = act_quant
        self.N, self.K = weight_i8.shape
        self.is_v7 = _is_v7()
        self.use_int8_mxu = (not self.is_v7) if use_int8_mxu is None else use_int8_mxu

        # VMEM budget per generation (v7x only has 64 MiB physical per core).
        self.vmem_limit = (48 << 20) if self.is_v7 else (64 << 20)
        self.vmem_budget = (self.vmem_limit * 3) // 4

        self.Kp = _round_up(self.K, 128)
        self.Np, self.tn = _choose_np_tn(self.N)
        tk_cands = _TK_CANDIDATES_INT8 if self.use_int8_mxu else _TK_CANDIDATES_BF16
        self.tk = _pick_tile(self.Kp, tk_cands)

        # One-time weight relayout: (N, K) int8 -> padded (Kp, Np).
        w_kn = jnp.asarray(weight_i8, jnp.int8).T
        if (self.Kp, self.Np) != w_kn.shape:
            w_kn = jnp.pad(w_kn, ((0, self.Kp - self.K), (0, self.Np - self.N)))
        if not self.use_int8_mxu:
            # Pre-cast once so the kernel does not re-cast the weight tile on
            # every (i, k) step (int8 values are exact in bf16).
            w_kn = w_kn.astype(jnp.bfloat16)
        self.w_kn = w_kn
        self.w_bytes = jnp.dtype(self.w_kn.dtype).itemsize

        if bias_f32 is None:
            self.bias2 = jnp.zeros((1, self.Np), jnp.float32)
        else:
            self.bias2 = jnp.pad(
                jnp.asarray(bias_f32, jnp.float32).reshape(1, self.N),
                ((0, 0), (0, self.Np - self.N)))

        self.dequant_scale = jnp.asarray(dequant_scale, jnp.float32)

    def __call__(self, x):
        x_shape = x.shape
        out_dtype = x.dtype
        assert x_shape[-1] == self.K
        x2 = x.reshape(-1, self.K)
        M = x2.shape[0]

        # ---- activation quantization (Pallas prologue kernel) --------------
        xq, qscale = _act_quant(x2, self.act_quant)
        row_dq = self.dequant_scale * qscale            # (M, 1) float32

        # ---- tile selection --------------------------------------------------
        tm = _choose_tm(M)
        Mp = _round_up(M, tm)
        out_bytes = jnp.dtype(out_dtype).itemsize
        tm, tn, tk = _fit_vmem(tm, self.tn, self.tk, 1, self.w_bytes,
                               out_bytes, self.vmem_budget, Mp)
        tm, tn = _split_for_two_cores(Mp, tm, self.Np, tn, self.is_v7)

        # ---- pad activations / scales (int8 + (M,1) f32: cheap) --------------
        if (Mp, self.Kp) != xq.shape:
            xq = jnp.pad(xq, ((0, Mp - M), (0, self.Kp - self.K)))
        if Mp != M:
            row_dq = jnp.pad(row_dq, ((0, Mp - M), (0, 0)))

        acc_dtype = jnp.int32 if self.use_int8_mxu else jnp.float32
        grid = (Mp // tm, self.Np // tn, self.Kp // tk)

        out = pl.pallas_call(
            functools.partial(_w8a8_matmul_kernel,
                              use_int8_mxu=self.use_int8_mxu),
            out_shape=jax.ShapeDtypeStruct((Mp, self.Np), out_dtype),
            grid=grid,
            in_specs=[
                pl.BlockSpec((tm, tk), lambda i, j, k: (i, k)),   # int8 act
                pl.BlockSpec((tk, tn), lambda i, j, k: (k, j)),   # weight (K,N)
                pl.BlockSpec((tm, 1), lambda i, j, k: (i, 0)),    # row dequant
                pl.BlockSpec((1, tn), lambda i, j, k: (0, j)),    # bias row
            ],
            out_specs=pl.BlockSpec((tm, tn), lambda i, j, k: (i, j)),
            scratch_shapes=[pltpu.VMEM((tm, tn), acc_dtype)],
            compiler_params=pltpu.CompilerParams(
                dimension_semantics=("parallel", "parallel", "arbitrary"),
                vmem_limit_bytes=self.vmem_limit),
            cost_estimate=pl.CostEstimate(
                flops=2 * Mp * self.Np * self.Kp,
                transcendentals=0,
                bytes_accessed=(Mp * self.Kp + self.Kp * self.Np * self.w_bytes
                                + Mp * self.Np * out_bytes
                                + 4 * (Mp + self.Np))),
        )(xq, self.w_kn, row_dq, self.bias2)

        if (Mp, self.Np) != (M, self.N):
            # TODO(synk): a masked final store would avoid this slice pass on
            # padded shapes; callers with MXU-aligned shapes skip it entirely.
            out = out[:M, :self.N]
        return out.reshape(*x_shape[:-1], self.N)


# ---------------------------------------------------------------------------
# Pure-JAX reference (mirror of the PyTorch forward)
# ---------------------------------------------------------------------------
def _reference(x, weight_i8, bias_f32, dequant_scale, act_quant):
    x_shape = x.shape
    dtype = x.dtype
    x2 = x.reshape(-1, x_shape[-1]).astype(jnp.float32)
    scale = jnp.asarray(dequant_scale, jnp.float32)
    if act_quant == "per-token":
        absmax = jnp.maximum(jnp.max(jnp.abs(x2), axis=-1, keepdims=True),
                             jnp.float32(1e-8))
        xq = jnp.clip(jnp.round(x2 * (127.0 / absmax)), -128, 127).astype(jnp.int8)
        dq = scale * (absmax * (1.0 / 127.0))
    else:
        xq = jnp.clip(jnp.round(x2), -128, 127).astype(jnp.int8)
        dq = scale
    out = lax.dot_general(xq, weight_i8, (((1,), (1,)), ((), ())),
                          preferred_element_type=jnp.int32).astype(jnp.float32)
    out = dq * out
    if bias_f32 is not None:
        out = out + bias_f32.astype(jnp.float32)
    return out.reshape(*x_shape[:-1], -1).astype(dtype)


if __name__ == "__main__":
    key = jax.random.PRNGKey(0)

    configs = [
        # (batch, seq, in_features, out_features)  -- small, module-consistent
        (2, 8, 32, 64),     # single-tile path
        (2, 8, 384, 384),   # multiple N and K tiles
    ]

    ok = True
    for cfg_idx, (batch, seq, in_features, out_features) in enumerate(configs):
        k_x, k_w, k_b = jax.random.split(jax.random.fold_in(key, cfg_idx), 3)

        # Activations scaled so per-tensor round/clamp is meaningful.
        x = (jax.random.normal(k_x, (batch, seq, in_features),
                               dtype=jnp.float32) * 20.0)
        weight_i8 = jax.random.randint(
            k_w, (out_features, in_features), -128, 128, dtype=jnp.int32
        ).astype(jnp.int8)
        bias_f32 = jax.random.normal(k_b, (out_features,),
                                     dtype=jnp.float32) * 0.1
        dequant_scale = jnp.float32(0.0123)

        for act_quant in ("per-tensor", "per-token"):
            layer = W8A8BFP32OFP32Linear(weight_i8, bias_f32, dequant_scale,
                                         act_quant=act_quant)
            y = jax.block_until_ready(layer(x))
            y_ref = _reference(x, weight_i8, bias_f32, dequant_scale, act_quant)
            if not jnp.allclose(y, y_ref, rtol=1e-5, atol=1e-3):
                ok = False

    if ok:
        print("KERNEL_OK")
</pallas_src>

<mosaic_0001>
module attributes {stable_mosaic.version = 11 : i64} {
  func.func @_act_quant_kernel(%arg0: i32, %arg1: memref<16x32xf32, #tpu.memory_space<vmem>>, %arg2: memref<16x32xi8, #tpu.memory_space<vmem>>, %arg3: memref<16x1xf32, #tpu.memory_space<vmem>>) attributes {dimension_semantics = [#tpu.dimension_semantics<parallel>], iteration_bounds = array<i64: 1>, scalar_prefetch = 0 : i64, scratch_operands = 0 : i64, tpu.core_type = #tpu.core_type<tc>, window_params = [{transform_indices = @transform_0, window_bounds = array<i64: 16, 32>}, {transform_indices = @transform_1, window_bounds = array<i64: 16, 32>}, {transform_indices = @transform_2, window_bounds = array<i64: 16, 1>}]} {
    %c0 = arith.constant 0 : index
    %c0_0 = arith.constant 0 : index
    %0 = vector.load %arg1[%c0, %c0_0] : memref<16x32xf32, #tpu.memory_space<vmem>>, vector<16x32xf32>
    %1 = math.roundeven %0 : vector<16x32xf32>
    %cst = arith.constant -1.280000e+02 : f32
    %cst_1 = arith.constant 1.270000e+02 : f32
    %2 = vector.broadcast %cst : f32 to vector<16x32xf32>
    %3 = arith.maximumf %2, %1 : vector<16x32xf32>
    %4 = vector.broadcast %cst_1 : f32 to vector<16x32xf32>
    %5 = arith.minimumf %4, %3 : vector<16x32xf32>
    %6 = arith.fptosi %5 : vector<16x32xf32> to vector<16x32xi8>
    %c0_2 = arith.constant 0 : index
    %c0_3 = arith.constant 0 : index
    %7 = vector.load %arg2[%c0_2, %c0_3] : memref<16x32xi8, #tpu.memory_space<vmem>>, vector<16x32xi8>
    tpu.vector_store %arg2[%c0_2, %c0_3], %6 {strides = array<i32>} : memref<16x32xi8, #tpu.memory_space<vmem>>, vector<16x32xi8>,
    %cst_4 = arith.constant 1.000000e+00 : f32
    %8 = vector.broadcast %cst_4 : f32 to vector<16x1xf32>
    %c0_5 = arith.constant 0 : index
    %c0_6 = arith.constant 0 : index
    %9 = vector.load %arg3[%c0_5, %c0_6] : memref<16x1xf32, #tpu.memory_space<vmem>>, vector<16x1xf32>
    tpu.vector_store %arg3[%c0_5, %c0_6], %8 {strides = array<i32>} : memref<16x1xf32, #tpu.memory_space<vmem>>, vector<16x1xf32>,
    return
  }
  func.func @transform_0(%arg0: i32) -> (i32, i32) {
    %c0_i32 = arith.constant 0 : i32
    %c0_i32_0 = arith.constant 0 : i32
    return %arg0, %c0_i32 : i32, i32
  }
  func.func @transform_1(%arg0: i32) -> (i32, i32) {
    %c0_i32 = arith.constant 0 : i32
    %c0_i32_0 = arith.constant 0 : i32
    return %arg0, %c0_i32 : i32, i32
  }
  func.func @transform_2(%arg0: i32) -> (i32, i32) {
    %c0_i32 = arith.constant 0 : i32
    %c0_i32_0 = arith.constant 0 : i32
    return %arg0, %c0_i32 : i32, i32
  }
}

</mosaic_0001>

<bundles_post_ra>
// kernel: tpu_custom_call.1
= control target key start
LH: loop header
LB: loop body
LE: loop exit
PB: predicated region body
PF: predicated region fallthrough
CT: control target
= control target key end

     0   :  { %8 = vsyncpa [#allocation3], 0  ;;  %s167_s0 = inlined_call_operand.hbm [shape: f32[16,32], index: 0, kind: input, shape index: {}]   ;;  %s168_s1 = inlined_call_operand.hbm [shape: s8[16,32], index: 1, kind: output, shape index: {0}]   ;;  %s169_s2 = inlined_call_operand.vmem [shape: f32[16,1], index: 2, kind: output, shape index: {1}]  }
   0x1   :  { %9 = vsyncpa [#allocation4], 0  ;;  %s133_s9 = smov [#allocation2]  }
   0x2   :  { %s15_s10 = sshll.u32 %s133_s9, 4  ;;  %s16_s10 = int_to_ptr.vmem [resolvable:$true] %s15_s10 }
   0x3   :  { %s97_s11 = scalar_lea.vmem %s16_s10, 256  ;;  %p102_p1 = scmp.lt.s32.totalorder %s16_s10, %s16_s10 }
   0x4   :  { %p98_p0 = scmp.ne.s32.totalorder %s16_s10, %s97_s11  ;;  %p103_p2 = scmp.lt.s32.totalorder %s97_s11, %s97_s11 }
   0x6   :  { %p104_p3 = por %p103_p2, %p102_p1 }
   0x8   :  { %p105_p4 = pnand %p104_p3, %p98_p0 }
   0xa   :  { %108 = shalt.err (!%p105_p4)
}
   0xb   :  { %s134_s12 = smov 128   ;;  %s135_s13 = smov 8  }
   0xc   :  { %21 = dma.hbm_to_vmem [thread:$0]  %s167_s0, 256, %s16_s10, [#allocation3], %s134_s12, %s134_s12, %s135_s13  }
   0xd   :  { %129 = dma.done.wait [#allocation3], 256  }
   0xe   :  { %130 = vsyncadd [#allocation3], 4294967040  ;;  %vm46_vm0 = vcmask 7168   ;;  %v136_v0 = vmov 1.0   ;;  %v25_v1 = vld [vmem:[#allocation2] sm:$0xff]  ;;  %v26_v2 = vld [vmem:[#allocation2 + $0x8] sm:$0xff] }
   0xf   :  { %47 = vst.msk [vmem:[%s169_s2] sm:$0xff] %vm46_vm0, %v136_v0  ;;  %48 = vst.msk [vmem:[%s169_s2 + $0x8] sm:$0xff] %vm46_vm0, %v136_v0  ;;  %v72_v3 = vclampa-f32 %v25_v1, -128, 127  ;;  %v74_v4 = vclampa-f32 %v26_v2, -128, 127 }
  0x10   :  { %s137_s20 = smov [#allocation5]   ;;  %vm43_vm1 = vcmask 254976  }
  0x11   :  { %v78_v5 = vcvt.f32.s32 %v72_v3  ;;  %v81_v6 = vcvt.f32.s32 %v74_v4  ;;  %s54_s0 = sshll.u32 %s137_s20, 4  ;;  %s55_s0 = int_to_ptr.vmem [resolvable:$true] %s54_s0 }
  0x12   :  { %s109_s21 = scalar_lea.vmem %s55_s0, 64  ;;  %p114_p6 = scmp.lt.s32.totalorder %s55_s0, %s55_s0 }
  0x13   :  { %v39_v7 = vpack.c.b16 %v78_v5, %v78_v5  ;;  %v41_v8 = vpack.c.b16 %v81_v6, %v81_v6  ;;  %p110_p5 = scmp.ne.s32.totalorder %s55_s0, %s109_s21  ;;  %p115_p7 = scmp.lt.s32.totalorder %s109_s21, %s109_s21 }
  0x15   :  { %v40_v9 = vpack.c.b8 %v39_v7, %v39_v7  ;;  %v42_v10 = vpack.c.b8 %v41_v8, %v41_v8  ;;  %p116_p8 = por %p115_p7, %p114_p6 }
  0x17   :  { %44 = vst.msk [vmem:[#allocation5] sm:$0x3] %vm43_vm1, %v40_v9  ;;  %45 = vst.msk [vmem:[#allocation5 + $0x2] sm:$0x3] %vm43_vm1, %v42_v10  ;;  %p117_p9 = pnand %p116_p8, %p110_p5 }
  0x19   :  { %120 = shalt.err (!%p117_p9)
}
  0x1a   :  { %s138_s2 = smov 32   ;;  %s139_s22 = smov 2  }
  0x1b   :  { %60 = dma.vmem_to_hbm [thread:$0]  %s55_s0, 64, %s168_s1, [#allocation4], %s138_s2, %s138_s2, %s139_s22  }
  0x1c   :  { %131 = dma.done.wait [#allocation4], 64  }
  0x1d   :  { %132 = vsyncadd [#allocation4], 4294967232 }
  0x1e   :  { %68 = vsyncpa [#allocation3], 1 }
  0x1f   :  { %69 = vsyncpa [#allocation4], 1 }

</bundles_post_ra>
